<compile_context>
chip_gen: v5e
topology: v5e:2x2
jax: 0.10.0
libtpu: 0.0.40
codegen_flags: <defaults>
</compile_context>

<pallas_src>
import functools

import jax
import jax.numpy as jnp
from jax.experimental import pallas as pl
from jax.experimental.pallas import tpu as pltpu

LANE = 128


def _round_up(x, m):
    return ((x + m - 1) // m) * m


def _pad2(a, rows, cols, dtype):
    """Zero-pad a 2-D array to (rows, cols) and cast."""
    out = jnp.zeros((rows, cols), jnp.float32)
    out = out.at[: a.shape[0], : a.shape[1]].set(a.astype(jnp.float32))
    return out.astype(dtype)


# ----------------------------- fused Pallas kernel ---------------------------

def _make_fused_kernel(n_layers, head_half, has_num):
    """x -> [Linear+ReLU]*n_layers -> merged dual head -> 0.5*(sig(z1)+sig(z2))."""

    def kernel(*refs):
        if has_num:
            xe_ref, xn_ref = refs[0], refs[1]
            wb = refs[2:-1]
        else:
            xe_ref, xn_ref = refs[0], None
            wb = refs[1:-1]
        out_ref = refs[-1]

        # ---- layer 0: split-K matmul (embeddings / numericals, no concat) ----
        idx = 0
        w0e = wb[idx][...]; idx += 1
        z = jnp.dot(xe_ref[...].astype(jnp.bfloat16), w0e,
                    preferred_element_type=jnp.float32)
        if has_num:
            w0n = wb[idx][...]; idx += 1
            z = z + jnp.dot(xn_ref[...].astype(jnp.bfloat16), w0n,
                            preferred_element_type=jnp.float32)
        b0 = wb[idx][...]; idx += 1
        h = jnp.maximum(z + b0, 0.0)

        # ---- remaining hidden layers ----
        for _ in range(1, n_layers):
            w = wb[idx][...]; b = wb[idx + 1][...]; idx += 2
            z = jnp.dot(h.astype(jnp.bfloat16), w,
                        preferred_element_type=jnp.float32) + b
            h = jnp.maximum(z, 0.0)

        # ---- merged dual classifier head (single lane-dense block) ----
        w_h = wb[idx][...]; b_h = wb[idx + 1][...]
        z = jnp.dot(h.astype(jnp.bfloat16), w_h,
                    preferred_element_type=jnp.float32) + b_h
        p = jax.nn.sigmoid(z)
        # clf_1 occupies lanes [0:clf), clf_2 lanes [head_half:head_half+clf);
        # lane-rotate by head_half (XLU, free slot) and average -> lanes [0:clf).
        out_ref[...] = 0.5 * (p + pltpu.roll(p, head_half, 1))

    return kernel


# --------------------------- parameter construction --------------------------

def _linear_params(key, fan_in, fan_out):
    # torch.nn.Linear default init: uniform +/- 1/sqrt(fan_in)
    kw, kb = jax.random.split(key)
    bound = 1.0 / jnp.sqrt(jnp.float32(fan_in))
    w = jax.random.uniform(kw, (fan_in, fan_out), jnp.float32, -bound, bound)
    b = jax.random.uniform(kb, (1, fan_out), jnp.float32, -bound, bound)
    return w, b


def init_mcd_params(key, *, n_fields, vocab_size, emb_dim, num_dim,
                    hidden_sizes, output_size, clf_size):
    keys = jax.random.split(key, 3 + len(hidden_sizes) + 1)
    params = {}
    params["embedding"] = jax.random.normal(
        keys[0], (n_fields, vocab_size, emb_dim), jnp.float32) * 0.05

    in_dim = n_fields * emb_dim + num_dim
    dims = [in_dim] + list(hidden_sizes) + [output_size]
    params["mlp"] = [
        _linear_params(keys[1 + i], dims[i], dims[i + 1])
        for i in range(len(dims) - 1)
    ]
    params["clf_1"] = _linear_params(keys[-2], output_size, clf_size)
    params["clf_2"] = _linear_params(keys[-1], output_size, clf_size)
    return params


# ------------------------------ fused forward --------------------------------

def mcd_forward(params, cat, num=None, *, tile_b=None, weight_buffer_count=1,
                kn_align=LANE):
    """cat: int32 [B, n_fields]; num: float32 [B, num_dim] or None."""
    emb = params["embedding"]                                    # (F, V, E) f32
    F, V, E = emb.shape
    B = cat.shape[0]

    # --- embedding gather (plain JAX; single fused XLA gather, no pad/concat) --
    # TODO(synk): for realistic vocab sizes, fuse this gather into the kernel
    # via PrefetchScalarGridSpec (scalar-prefetched `cat` + per-field row DMA).
    flat_emb = emb.reshape(F * V, E)
    flat_idx = cat.astype(jnp.int32) + (jnp.arange(F, dtype=jnp.int32) * V)[None, :]
    x_emb = jnp.take(flat_emb, flat_idx, axis=0).reshape(B, F * E)  # (B, F*E) f32
    has_num = num is not None
    x_num = num.astype(jnp.float32) if has_num else None
    d_emb = F * E
    d_num = x_num.shape[1] if has_num else 0

    if tile_b is None:
        tile_b = min(1024, _round_up(B, 8))        # big tiles ~85% of HBM roofline
    grid = (pl.cdiv(B, tile_b),)                   # edge block masked, no B padding

    # --- weights: pad K/N to lane tiles, cast matmul operands to bf16 ----------
    # (zero-padded columns -> ReLU(0)=0 -> zero rows of next weight contribute 0)
    # TODO(synk): on v6e/v7x with real layer widths (>128) pass kn_align=256 to
    # fill the 2x256 MXU; 128 is right for v5e and for these toy widths.
    mlp = params["mlp"]
    n_layers = len(mlp)
    weight_inputs = []

    w0, b0 = mlp[0]
    n0_pad = _round_up(w0.shape[1], kn_align)
    weight_inputs.append(_pad2(w0[:d_emb], d_emb, n0_pad, jnp.bfloat16))   # W0_emb
    if has_num:
        weight_inputs.append(_pad2(w0[d_emb:], d_num, n0_pad, jnp.bfloat16))  # W0_num
    weight_inputs.append(_pad2(b0, 1, n0_pad, jnp.float32))

    in_pad = n0_pad
    for (w, b) in mlp[1:]:
        n_pad = _round_up(w.shape[1], kn_align)
        weight_inputs.append(_pad2(w, in_pad, n_pad, jnp.bfloat16))
        weight_inputs.append(_pad2(b, 1, n_pad, jnp.float32))
        in_pad = n_pad

    # head: pack clf_1 / clf_2 into ONE lane block (width 128 when clf <= 64)
    (w1, b1), (w2, b2) = params["clf_1"], params["clf_2"]
    out_dim, clf = w1.shape
    head_half = 64 if clf <= 64 else _round_up(clf, LANE)
    head_w = 2 * head_half
    wh = jnp.zeros((in_pad, head_w), jnp.float32)
    wh = wh.at[:out_dim, :clf].set(w1).at[:out_dim, head_half:head_half + clf].set(w2)
    bh = jnp.zeros((1, head_w), jnp.float32)
    bh = bh.at[:, :clf].set(b1).at[:, head_half:head_half + clf].set(b2)
    weight_inputs.append(wh.astype(jnp.bfloat16))
    weight_inputs.append(bh)

    # --- BlockSpecs -------------------------------------------------------------
    def _wspec(shape):
        # constant index_map -> fetched once, VMEM-resident across the batch grid
        if weight_buffer_count is None:
            return pl.BlockSpec(shape, lambda i: (0, 0))
        return pl.BlockSpec(shape, lambda i: (0, 0),
                            pipeline_mode=pl.Buffered(weight_buffer_count))

    in_specs = [pl.BlockSpec((tile_b, d_emb), lambda i: (i, 0))]
    call_inputs = [x_emb]
    if has_num:
        in_specs.append(pl.BlockSpec((tile_b, d_num), lambda i: (i, 0)))
        call_inputs.append(x_num)
    in_specs += [_wspec(w.shape) for w in weight_inputs]
    call_inputs += weight_inputs
    out_spec = pl.BlockSpec((tile_b, head_w), lambda i: (i, 0))

    # --- advisory cost estimate ---------------------------------------------------
    flops = 2 * B * (d_emb + d_num) * n0_pad
    k_prev = n0_pad
    for (w, _) in mlp[1:]:
        n_pad = _round_up(w.shape[1], kn_align)
        flops += 2 * B * k_prev * n_pad
        k_prev = n_pad
    flops += 2 * B * k_prev * head_w
    weight_bytes = sum(int(a.size) * a.dtype.itemsize for a in weight_inputs)
    bytes_accessed = 4 * (B * (d_emb + d_num) + B * head_w) + weight_bytes
    cost = pl.CostEstimate(flops=int(flops),
                           transcendentals=int(B * 2 * clf),
                           bytes_accessed=int(bytes_accessed))

    # --- VMEM budget (v7x-safe: single-buffered weights + 2x in/out tiles) --------
    nbuf = 2 if weight_buffer_count is None else weight_buffer_count
    act_bytes = 2 * (tile_b * (d_emb + d_num) * 4 + tile_b * head_w * 4)
    needed = nbuf * weight_bytes + act_bytes + (4 << 20)
    vmem_limit = min(max(needed, 32 << 20), 48 << 20)
    vmem_limit = max(vmem_limit, needed)

    kernel = _make_fused_kernel(n_layers, head_half, has_num)
    out = pl.pallas_call(
        kernel,
        out_shape=jax.ShapeDtypeStruct((B, head_w), jnp.float32),
        grid=grid,
        in_specs=in_specs,
        out_specs=out_spec,
        compiler_params=pltpu.CompilerParams(
            dimension_semantics=("parallel",),
            vmem_limit_bytes=int(vmem_limit)),
        cost_estimate=cost,
    )(*call_inputs)

    return out[:, :clf]


# ----------------------- pure-JAX reference (f32, unpadded) ------------------

def mcd_forward_ref(params, cat, num=None):
    emb = params["embedding"]
    F, V, E = emb.shape
    B = cat.shape[0]
    flat_emb = emb.reshape(F * V, E)
    flat_idx = cat.astype(jnp.int32) + (jnp.arange(F, dtype=jnp.int32) * V)[None, :]
    x = jnp.take(flat_emb, flat_idx, axis=0).reshape(B, F * E)
    if num is not None:
        x = jnp.concatenate([x, num.astype(jnp.float32)], axis=-1)
    hid = x
    for (w, b) in params["mlp"]:
        hid = jnp.maximum(hid @ w + b, 0.0)
    w1, b1 = params["clf_1"]
    w2, b2 = params["clf_2"]
    return 0.5 * (jax.nn.sigmoid(hid @ w1 + b1) + jax.nn.sigmoid(hid @ w2 + b2))


# ---------------------------------- main --------------------------------------

if __name__ == "__main__":
    key = jax.random.PRNGKey(0)
    k_params, k_cat, k_num = jax.random.split(key, 3)

    # small, MLP-base-consistent shapes
    B = 8            # batch
    F = 4            # categorical fields
    V = 10           # vocab size per field
    E = 8            # embedding dim
    NUM = 4          # numerical feature dim
    HIDDEN = (32, 32)
    OUT = 16         # base_configs['output_size']
    CLF = 1          # clf_size

    params = init_mcd_params(
        k_params, n_fields=F, vocab_size=V, emb_dim=E, num_dim=NUM,
        hidden_sizes=HIDDEN, output_size=OUT, clf_size=CLF)

    cat = jax.random.randint(k_cat, (B, F), 0, V, dtype=jnp.int32)
    num = jax.random.normal(k_num, (B, NUM), jnp.float32)

    def run(wbc):
        fn = jax.jit(functools.partial(mcd_forward, weight_buffer_count=wbc))
        return jax.block_until_ready(fn(params, cat, num))

    try:
        pred = run(1)        # single-buffered VMEM-resident weights (v7x-friendly)
    except Exception:
        # Fallback if this JAX build rejects pl.Buffered(1) on input BlockSpecs.
        pred = run(None)

    ref = mcd_forward_ref(params, cat, num)
    assert pred.shape == (B, CLF)
    # bf16 MXU operands (f32 accumulation) vs f32 reference -> loose tolerance.
    assert jnp.allclose(pred, ref, atol=2e-2, rtol=2e-2), "mismatch vs reference"

    # TODO(synk): step_a/step_b/step_c (BCE losses, discrepancy, Adam updates) are
    # host-side training logic; only the forward hot path is kernelized.
    print("KERNEL_OK")
</pallas_src>

<mosaic_0001>
module attributes {stable_mosaic.version = 11 : i64} {
  func.func @kernel(%arg0: i32, %arg1: memref<8x32xf32, #tpu.memory_space<vmem>>, %arg2: memref<8x4xf32, #tpu.memory_space<vmem>>, %arg3: memref<32x128xbf16, #tpu.memory_space<vmem>>, %arg4: memref<4x128xbf16, #tpu.memory_space<vmem>>, %arg5: memref<1x128xf32, #tpu.memory_space<vmem>>, %arg6: memref<128x128xbf16, #tpu.memory_space<vmem>>, %arg7: memref<1x128xf32, #tpu.memory_space<vmem>>, %arg8: memref<128x128xbf16, #tpu.memory_space<vmem>>, %arg9: memref<1x128xf32, #tpu.memory_space<vmem>>, %arg10: memref<128x128xbf16, #tpu.memory_space<vmem>>, %arg11: memref<1x128xf32, #tpu.memory_space<vmem>>, %arg12: memref<8x128xf32, #tpu.memory_space<vmem>>) attributes {dimension_semantics = [#tpu.dimension_semantics<parallel>], iteration_bounds = array<i64: 1>, scalar_prefetch = 0 : i64, scratch_operands = 0 : i64, tpu.core_type = #tpu.core_type<tc>, window_params = [{transform_indices = @transform_0, window_bounds = array<i64: 8, 32>}, {transform_indices = @transform_1, window_bounds = array<i64: 8, 4>}, {pipeline_mode = #tpu.pipeline_mode<synchronous>, transform_indices = @transform_2, window_bounds = array<i64: 32, 128>}, {pipeline_mode = #tpu.pipeline_mode<synchronous>, transform_indices = @transform_3, window_bounds = array<i64: 4, 128>}, {pipeline_mode = #tpu.pipeline_mode<synchronous>, transform_indices = @transform_4, window_bounds = array<i64: 1, 128>}, {pipeline_mode = #tpu.pipeline_mode<synchronous>, transform_indices = @transform_5, window_bounds = array<i64: 128, 128>}, {pipeline_mode = #tpu.pipeline_mode<synchronous>, transform_indices = @transform_6, window_bounds = array<i64: 1, 128>}, {pipeline_mode = #tpu.pipeline_mode<synchronous>, transform_indices = @transform_7, window_bounds = array<i64: 128, 128>}, {pipeline_mode = #tpu.pipeline_mode<synchronous>, transform_indices = @transform_8, window_bounds = array<i64: 1, 128>}, {pipeline_mode = #tpu.pipeline_mode<synchronous>, transform_indices = @transform_9, window_bounds = array<i64: 128, 128>}, {pipeline_mode = #tpu.pipeline_mode<synchronous>, transform_indices = @transform_10, window_bounds = array<i64: 1, 128>}, {transform_indices = @transform_11, window_bounds = array<i64: 8, 128>}]} {
    %c0 = arith.constant 0 : index
    %c0_0 = arith.constant 0 : index
    %0 = vector.load %arg3[%c0, %c0_0] : memref<32x128xbf16, #tpu.memory_space<vmem>>, vector<32x128xbf16>
    %c0_1 = arith.constant 0 : index
    %c0_2 = arith.constant 0 : index
    %1 = vector.load %arg1[%c0_1, %c0_2] : memref<8x32xf32, #tpu.memory_space<vmem>>, vector<8x32xf32>
    %2 = arith.truncf %1 : vector<8x32xf32> to vector<8x32xbf16>
    %cst = arith.constant dense<0.000000e+00> : vector<8x128xf32>
    %3 = tpu.matmul %2, %0, %cst {dimension_numbers = #tpu.dot_dimension_numbers<[1], [0], [0], [1], [0, 0, 1, 1], [], []>} : vector<8x32xbf16>, vector<32x128xbf16>, vector<8x128xf32> -> vector<8x128xf32>
    %c0_3 = arith.constant 0 : index
    %c0_4 = arith.constant 0 : index
    %4 = vector.load %arg4[%c0_3, %c0_4] : memref<4x128xbf16, #tpu.memory_space<vmem>>, vector<4x128xbf16>
    %c0_5 = arith.constant 0 : index
    %c0_6 = arith.constant 0 : index
    %5 = vector.load %arg2[%c0_5, %c0_6] : memref<8x4xf32, #tpu.memory_space<vmem>>, vector<8x4xf32>
    %6 = arith.truncf %5 : vector<8x4xf32> to vector<8x4xbf16>
    %cst_7 = arith.constant dense<0.000000e+00> : vector<8x128xf32>
    %7 = tpu.matmul %6, %4, %cst_7 {dimension_numbers = #tpu.dot_dimension_numbers<[1], [0], [0], [1], [0, 0, 1, 1], [], []>} : vector<8x4xbf16>, vector<4x128xbf16>, vector<8x128xf32> -> vector<8x128xf32>
    %8 = arith.addf %3, %7 : vector<8x128xf32>
    %c0_8 = arith.constant 0 : index
    %c0_9 = arith.constant 0 : index
    %9 = vector.load %arg5[%c0_8, %c0_9] : memref<1x128xf32, #tpu.memory_space<vmem>>, vector<1x128xf32>
    %10 = vector.broadcast %9 : vector<1x128xf32> to vector<8x128xf32>
    %11 = arith.addf %8, %10 : vector<8x128xf32>
    %cst_10 = arith.constant 0.000000e+00 : f32
    %12 = vector.broadcast %cst_10 : f32 to vector<8x128xf32>
    %13 = arith.maximumf %11, %12 : vector<8x128xf32>
    %c0_11 = arith.constant 0 : index
    %c0_12 = arith.constant 0 : index
    %14 = vector.load %arg6[%c0_11, %c0_12] : memref<128x128xbf16, #tpu.memory_space<vmem>>, vector<128x128xbf16>
    %c0_13 = arith.constant 0 : index
    %c0_14 = arith.constant 0 : index
    %15 = vector.load %arg7[%c0_13, %c0_14] : memref<1x128xf32, #tpu.memory_space<vmem>>, vector<1x128xf32>
    %16 = arith.truncf %13 : vector<8x128xf32> to vector<8x128xbf16>
    %cst_15 = arith.constant dense<0.000000e+00> : vector<8x128xf32>
    %17 = tpu.matmul %16, %14, %cst_15 {dimension_numbers = #tpu.dot_dimension_numbers<[1], [0], [0], [1], [0, 0, 1, 1], [], []>} : vector<8x128xbf16>, vector<128x128xbf16>, vector<8x128xf32> -> vector<8x128xf32>
    %18 = vector.broadcast %15 : vector<1x128xf32> to vector<8x128xf32>
    %19 = arith.addf %17, %18 : vector<8x128xf32>
    %cst_16 = arith.constant 0.000000e+00 : f32
    %20 = vector.broadcast %cst_16 : f32 to vector<8x128xf32>
    %21 = arith.maximumf %19, %20 : vector<8x128xf32>
    %c0_17 = arith.constant 0 : index
    %c0_18 = arith.constant 0 : index
    %22 = vector.load %arg8[%c0_17, %c0_18] : memref<128x128xbf16, #tpu.memory_space<vmem>>, vector<128x128xbf16>
    %c0_19 = arith.constant 0 : index
    %c0_20 = arith.constant 0 : index
    %23 = vector.load %arg9[%c0_19, %c0_20] : memref<1x128xf32, #tpu.memory_space<vmem>>, vector<1x128xf32>
    %24 = arith.truncf %21 : vector<8x128xf32> to vector<8x128xbf16>
    %cst_21 = arith.constant dense<0.000000e+00> : vector<8x128xf32>
    %25 = tpu.matmul %24, %22, %cst_21 {dimension_numbers = #tpu.dot_dimension_numbers<[1], [0], [0], [1], [0, 0, 1, 1], [], []>} : vector<8x128xbf16>, vector<128x128xbf16>, vector<8x128xf32> -> vector<8x128xf32>
    %26 = vector.broadcast %23 : vector<1x128xf32> to vector<8x128xf32>
    %27 = arith.addf %25, %26 : vector<8x128xf32>
    %cst_22 = arith.constant 0.000000e+00 : f32
    %28 = vector.broadcast %cst_22 : f32 to vector<8x128xf32>
    %29 = arith.maximumf %27, %28 : vector<8x128xf32>
    %c0_23 = arith.constant 0 : index
    %c0_24 = arith.constant 0 : index
    %30 = vector.load %arg10[%c0_23, %c0_24] : memref<128x128xbf16, #tpu.memory_space<vmem>>, vector<128x128xbf16>
    %c0_25 = arith.constant 0 : index
    %c0_26 = arith.constant 0 : index
    %31 = vector.load %arg11[%c0_25, %c0_26] : memref<1x128xf32, #tpu.memory_space<vmem>>, vector<1x128xf32>
    %32 = arith.truncf %29 : vector<8x128xf32> to vector<8x128xbf16>
    %cst_27 = arith.constant dense<0.000000e+00> : vector<8x128xf32>
    %33 = tpu.matmul %32, %30, %cst_27 {dimension_numbers = #tpu.dot_dimension_numbers<[1], [0], [0], [1], [0, 0, 1, 1], [], []>} : vector<8x128xbf16>, vector<128x128xbf16>, vector<8x128xf32> -> vector<8x128xf32>
    %34 = vector.broadcast %31 : vector<1x128xf32> to vector<8x128xf32>
    %35 = arith.addf %33, %34 : vector<8x128xf32>
    %36 = arith.negf %35 : vector<8x128xf32>
    %37 = math.exp %36 : vector<8x128xf32>
    %cst_28 = arith.constant 1.000000e+00 : f32
    %38 = vector.broadcast %cst_28 : f32 to vector<8x128xf32>
    %39 = arith.addf %38, %37 : vector<8x128xf32>
    %40 = arith.divf %38, %39 : vector<8x128xf32>
    %c64_i32 = arith.constant 64 : i32
    %41 = tpu.dynamic_rotate %40 by %c64_i32 dim 1 : vector<8x128xf32>, i32 -> vector<8x128xf32>
    %42 = arith.addf %40, %41 : vector<8x128xf32>
    %cst_29 = arith.constant 5.000000e-01 : f32
    %43 = vector.broadcast %cst_29 : f32 to vector<8x128xf32>
    %44 = arith.mulf %43, %42 : vector<8x128xf32>
    %c0_30 = arith.constant 0 : index
    %c0_31 = arith.constant 0 : index
    %45 = vector.load %arg12[%c0_30, %c0_31] : memref<8x128xf32, #tpu.memory_space<vmem>>, vector<8x128xf32>
    tpu.vector_store %arg12[%c0_30, %c0_31], %44 {strides = array<i32>} : memref<8x128xf32, #tpu.memory_space<vmem>>, vector<8x128xf32>,
    return
  }
  func.func @transform_0(%arg0: i32) -> (i32, i32) {
    %c0_i32 = arith.constant 0 : i32
    %c0_i32_0 = arith.constant 0 : i32
    return %arg0, %c0_i32 : i32, i32
  }
  func.func @transform_1(%arg0: i32) -> (i32, i32) {
    %c0_i32 = arith.constant 0 : i32
    %c0_i32_0 = arith.constant 0 : i32
    return %arg0, %c0_i32 : i32, i32
  }
  func.func @transform_2(%arg0: i32) -> (i32, i32) {
    %c0_i32 = arith.constant 0 : i32
    %c0_i32_0 = arith.constant 0 : i32
    %c0_i32_1 = arith.constant 0 : i32
    return %c0_i32, %c0_i32_0 : i32, i32
  }
  func.func @transform_3(%arg0: i32) -> (i32, i32) {
    %c0_i32 = arith.constant 0 : i32
    %c0_i32_0 = arith.constant 0 : i32
    %c0_i32_1 = arith.constant 0 : i32
    return %c0_i32, %c0_i32_0 : i32, i32
  }
  func.func @transform_4(%arg0: i32) -> (i32, i32) {
    %c0_i32 = arith.constant 0 : i32
    %c0_i32_0 = arith.constant 0 : i32
    %c0_i32_1 = arith.constant 0 : i32
    return %c0_i32, %c0_i32_0 : i32, i32
  }
  func.func @transform_5(%arg0: i32) -> (i32, i32) {
    %c0_i32 = arith.constant 0 : i32
    %c0_i32_0 = arith.constant 0 : i32
    %c0_i32_1 = arith.constant 0 : i32
    return %c0_i32, %c0_i32_0 : i32, i32
  }
  func.func @transform_6(%arg0: i32) -> (i32, i32) {
    %c0_i32 = arith.constant 0 : i32
    %c0_i32_0 = arith.constant 0 : i32
    %c0_i32_1 = arith.constant 0 : i32
    return %c0_i32, %c0_i32_0 : i32, i32
  }
  func.func @transform_7(%arg0: i32) -> (i32, i32) {
    %c0_i32 = arith.constant 0 : i32
    %c0_i32_0 = arith.constant 0 : i32
    %c0_i32_1 = arith.constant 0 : i32
    return %c0_i32, %c0_i32_0 : i32, i32
  }
  func.func @transform_8(%arg0: i32) -> (i32, i32) {
    %c0_i32 = arith.constant 0 : i32
    %c0_i32_0 = arith.constant 0 : i32
    %c0_i32_1 = arith.constant 0 : i32
    return %c0_i32, %c0_i32_0 : i32, i32
  }
  func.func @transform_9(%arg0: i32) -> (i32, i32) {
    %c0_i32 = arith.constant 0 : i32
    %c0_i32_0 = arith.constant 0 : i32
    %c0_i32_1 = arith.constant 0 : i32
    return %c0_i32, %c0_i32_0 : i32, i32
  }
  func.func @transform_10(%arg0: i32) -> (i32, i32) {
    %c0_i32 = arith.constant 0 : i32
    %c0_i32_0 = arith.constant 0 : i32
    %c0_i32_1 = arith.constant 0 : i32
    return %c0_i32, %c0_i32_0 : i32, i32
  }
  func.func @transform_11(%arg0: i32) -> (i32, i32) {
    %c0_i32 = arith.constant 0 : i32
    %c0_i32_0 = arith.constant 0 : i32
    return %arg0, %c0_i32 : i32, i32
  }
}

module attributes {stable_mosaic.version = 11 : i64} {
  func.func @kernel(%arg0: i32, %arg1: memref<8x32xf32, #tpu.memory_space<vmem>>, %arg2: memref<8x4xf32, #tpu.memory_space<vmem>>, %arg3: memref<32x128xbf16, #tpu.memory_space<vmem>>, %arg4: memref<4x128xbf16, #tpu.memory_space<vmem>>, %arg5: memref<1x128xf32, #tpu.memory_space<vmem>>, %arg6: memref<128x128xbf16, #tpu.memory_space<vmem>>, %arg7: memref<1x128xf32, #tpu.memory_space<vmem>>, %arg8: memref<128x128xbf16, #tpu.memory_space<vmem>>, %arg9: memref<1x128xf32, #tpu.memory_space<vmem>>, %arg10: memref<128x128xbf16, #tpu.memory_space<vmem>>, %arg11: memref<1x128xf32, #tpu.memory_space<vmem>>, %arg12: memref<8x128xf32, #tpu.memory_space<vmem>>) attributes {dimension_semantics = [#tpu.dimension_semantics<parallel>], iteration_bounds = array<i64: 1>, scalar_prefetch = 0 : i64, scratch_operands = 0 : i64, tpu.core_type = #tpu.core_type<tc>, window_params = [{transform_indices = @transform_0, window_bounds = array<i64: 8, 32>}, {transform_indices = @transform_1, window_bounds = array<i64: 8, 4>}, {pipeline_mode = #tpu.pipeline_mode<synchronous>, transform_indices = @transform_2, window_bounds = array<i64: 32, 128>}, {pipeline_mode = #tpu.pipeline_mode<synchronous>, transform_indices = @transform_3, window_bounds = array<i64: 4, 128>}, {pipeline_mode = #tpu.pipeline_mode<synchronous>, transform_indices = @transform_4, window_bounds = array<i64: 1, 128>}, {pipeline_mode = #tpu.pipeline_mode<synchronous>, transform_indices = @transform_5, window_bounds = array<i64: 128, 128>}, {pipeline_mode = #tpu.pipeline_mode<synchronous>, transform_indices = @transform_6, window_bounds = array<i64: 1, 128>}, {pipeline_mode = #tpu.pipeline_mode<synchronous>, transform_indices = @transform_7, window_bounds = array<i64: 128, 128>}, {pipeline_mode = #tpu.pipeline_mode<synchronous>, transform_indices = @transform_8, window_bounds = array<i64: 1, 128>}, {pipeline_mode = #tpu.pipeline_mode<synchronous>, transform_indices = @transform_9, window_bounds = array<i64: 128, 128>}, {pipeline_mode = #tpu.pipeline_mode<synchronous>, transform_indices = @transform_10, window_bounds = array<i64: 1, 128>}, {transform_indices = @transform_11, window_bounds = array<i64: 8, 128>}]} {
    %c0 = arith.constant 0 : index
    %c0_0 = arith.constant 0 : index
    %0 = vector.load %arg3[%c0, %c0_0] : memref<32x128xbf16, #tpu.memory_space<vmem>>, vector<32x128xbf16>
    %c0_1 = arith.constant 0 : index
    %c0_2 = arith.constant 0 : index
    %1 = vector.load %arg1[%c0_1, %c0_2] : memref<8x32xf32, #tpu.memory_space<vmem>>, vector<8x32xf32>
    %2 = arith.truncf %1 : vector<8x32xf32> to vector<8x32xbf16>
    %cst = arith.constant dense<0.000000e+00> : vector<8x128xf32>
    %3 = tpu.matmul %2, %0, %cst {dimension_numbers = #tpu.dot_dimension_numbers<[1], [0], [0], [1], [0, 0, 1, 1], [], []>} : vector<8x32xbf16>, vector<32x128xbf16>, vector<8x128xf32> -> vector<8x128xf32>
    %c0_3 = arith.constant 0 : index
    %c0_4 = arith.constant 0 : index
    %4 = vector.load %arg4[%c0_3, %c0_4] : memref<4x128xbf16, #tpu.memory_space<vmem>>, vector<4x128xbf16>
    %c0_5 = arith.constant 0 : index
    %c0_6 = arith.constant 0 : index
    %5 = vector.load %arg2[%c0_5, %c0_6] : memref<8x4xf32, #tpu.memory_space<vmem>>, vector<8x4xf32>
    %6 = arith.truncf %5 : vector<8x4xf32> to vector<8x4xbf16>
    %cst_7 = arith.constant dense<0.000000e+00> : vector<8x128xf32>
    %7 = tpu.matmul %6, %4, %cst_7 {dimension_numbers = #tpu.dot_dimension_numbers<[1], [0], [0], [1], [0, 0, 1, 1], [], []>} : vector<8x4xbf16>, vector<4x128xbf16>, vector<8x128xf32> -> vector<8x128xf32>
    %8 = arith.addf %3, %7 : vector<8x128xf32>
    %c0_8 = arith.constant 0 : index
    %c0_9 = arith.constant 0 : index
    %9 = vector.load %arg5[%c0_8, %c0_9] : memref<1x128xf32, #tpu.memory_space<vmem>>, vector<1x128xf32>
    %10 = vector.broadcast %9 : vector<1x128xf32> to vector<8x128xf32>
    %11 = arith.addf %8, %10 : vector<8x128xf32>
    %cst_10 = arith.constant 0.000000e+00 : f32
    %12 = vector.broadcast %cst_10 : f32 to vector<8x128xf32>
    %13 = arith.maximumf %11, %12 : vector<8x128xf32>
    %c0_11 = arith.constant 0 : index
    %c0_12 = arith.constant 0 : index
    %14 = vector.load %arg6[%c0_11, %c0_12] : memref<128x128xbf16, #tpu.memory_space<vmem>>, vector<128x128xbf16>
    %c0_13 = arith.constant 0 : index
    %c0_14 = arith.constant 0 : index
    %15 = vector.load %arg7[%c0_13, %c0_14] : memref<1x128xf32, #tpu.memory_space<vmem>>, vector<1x128xf32>
    %16 = arith.truncf %13 : vector<8x128xf32> to vector<8x128xbf16>
    %cst_15 = arith.constant dense<0.000000e+00> : vector<8x128xf32>
    %17 = tpu.matmul %16, %14, %cst_15 {dimension_numbers = #tpu.dot_dimension_numbers<[1], [0], [0], [1], [0, 0, 1, 1], [], []>} : vector<8x128xbf16>, vector<128x128xbf16>, vector<8x128xf32> -> vector<8x128xf32>
    %18 = vector.broadcast %15 : vector<1x128xf32> to vector<8x128xf32>
    %19 = arith.addf %17, %18 : vector<8x128xf32>
    %cst_16 = arith.constant 0.000000e+00 : f32
    %20 = vector.broadcast %cst_16 : f32 to vector<8x128xf32>
    %21 = arith.maximumf %19, %20 : vector<8x128xf32>
    %c0_17 = arith.constant 0 : index
    %c0_18 = arith.constant 0 : index
    %22 = vector.load %arg8[%c0_17, %c0_18] : memref<128x128xbf16, #tpu.memory_space<vmem>>, vector<128x128xbf16>
    %c0_19 = arith.constant 0 : index
    %c0_20 = arith.constant 0 : index
    %23 = vector.load %arg9[%c0_19, %c0_20] : memref<1x128xf32, #tpu.memory_space<vmem>>, vector<1x128xf32>
    %24 = arith.truncf %21 : vector<8x128xf32> to vector<8x128xbf16>
    %cst_21 = arith.constant dense<0.000000e+00> : vector<8x128xf32>
    %25 = tpu.matmul %24, %22, %cst_21 {dimension_numbers = #tpu.dot_dimension_numbers<[1], [0], [0], [1], [0, 0, 1, 1], [], []>} : vector<8x128xbf16>, vector<128x128xbf16>, vector<8x128xf32> -> vector<8x128xf32>
    %26 = vector.broadcast %23 : vector<1x128xf32> to vector<8x128xf32>
    %27 = arith.addf %25, %26 : vector<8x128xf32>
    %cst_22 = arith.constant 0.000000e+00 : f32
    %28 = vector.broadcast %cst_22 : f32 to vector<8x128xf32>
    %29 = arith.maximumf %27, %28 : vector<8x128xf32>
    %c0_23 = arith.constant 0 : index
    %c0_24 = arith.constant 0 : index
    %30 = vector.load %arg10[%c0_23, %c0_24] : memref<128x128xbf16, #tpu.memory_space<vmem>>, vector<128x128xbf16>
    %c0_25 = arith.constant 0 : index
    %c0_26 = arith.constant 0 : index
    %31 = vector.load %arg11[%c0_25, %c0_26] : memref<1x128xf32, #tpu.memory_space<vmem>>, vector<1x128xf32>
    %32 = arith.truncf %29 : vector<8x128xf32> to vector<8x128xbf16>
    %cst_27 = arith.constant dense<0.000000e+00> : vector<8x128xf32>
    %33 = tpu.matmul %32, %30, %cst_27 {dimension_numbers = #tpu.dot_dimension_numbers<[1], [0], [0], [1], [0, 0, 1, 1], [], []>} : vector<8x128xbf16>, vector<128x128xbf16>, vector<8x128xf32> -> vector<8x128xf32>
    %34 = vector.broadcast %31 : vector<1x128xf32> to vector<8x128xf32>
    %35 = arith.addf %33, %34 : vector<8x128xf32>
    %36 = arith.negf %35 : vector<8x128xf32>
    %37 = math.exp %36 : vector<8x128xf32>
    %cst_28 = arith.constant 1.000000e+00 : f32
    %38 = vector.broadcast %cst_28 : f32 to vector<8x128xf32>
    %39 = arith.addf %38, %37 : vector<8x128xf32>
    %40 = arith.divf %38, %39 : vector<8x128xf32>
    %c64_i32 = arith.constant 64 : i32
    %41 = tpu.dynamic_rotate %40 by %c64_i32 dim 1 : vector<8x128xf32>, i32 -> vector<8x128xf32>
    %42 = arith.addf %40, %41 : vector<8x128xf32>
    %cst_29 = arith.constant 5.000000e-01 : f32
    %43 = vector.broadcast %cst_29 : f32 to vector<8x128xf32>
    %44 = arith.mulf %43, %42 : vector<8x128xf32>
    %c0_30 = arith.constant 0 : index
    %c0_31 = arith.constant 0 : index
    %45 = vector.load %arg12[%c0_30, %c0_31] : memref<8x128xf32, #tpu.memory_space<vmem>>, vector<8x128xf32>
    tpu.vector_store %arg12[%c0_30, %c0_31], %44 {strides = array<i32>} : memref<8x128xf32, #tpu.memory_space<vmem>>, vector<8x128xf32>,
    return
  }
  func.func @transform_0(%arg0: i32) -> (i32, i32) {
    %c0_i32 = arith.constant 0 : i32
    %c0_i32_0 = arith.constant 0 : i32
    return %arg0, %c0_i32 : i32, i32
  }
  func.func @transform_1(%arg0: i32) -> (i32, i32) {
    %c0_i32 = arith.constant 0 : i32
    %c0_i32_0 = arith.constant 0 : i32
    return %arg0, %c0_i32 : i32, i32
  }
  func.func @transform_2(%arg0: i32) -> (i32, i32) {
    %c0_i32 = arith.constant 0 : i32
    %c0_i32_0 = arith.constant 0 : i32
    %c0_i32_1 = arith.constant 0 : i32
    return %c0_i32, %c0_i32_0 : i32, i32
  }
  func.func @transform_3(%arg0: i32) -> (i32, i32) {
    %c0_i32 = arith.constant 0 : i32
    %c0_i32_0 = arith.constant 0 : i32
    %c0_i32_1 = arith.constant 0 : i32
    return %c0_i32, %c0_i32_0 : i32, i32
  }
  func.func @transform_4(%arg0: i32) -> (i32, i32) {
    %c0_i32 = arith.constant 0 : i32
    %c0_i32_0 = arith.constant 0 : i32
    %c0_i32_1 = arith.constant 0 : i32
    return %c0_i32, %c0_i32_0 : i32, i32
  }
  func.func @transform_5(%arg0: i32) -> (i32, i32) {
    %c0_i32 = arith.constant 0 : i32
    %c0_i32_0 = arith.constant 0 : i32
    %c0_i32_1 = arith.constant 0 : i32
    return %c0_i32, %c0_i32_0 : i32, i32
  }
  func.func @transform_6(%arg0: i32) -> (i32, i32) {
    %c0_i32 = arith.constant 0 : i32
    %c0_i32_0 = arith.constant 0 : i32
    %c0_i32_1 = arith.constant 0 : i32
    return %c0_i32, %c0_i32_0 : i32, i32
  }
  func.func @transform_7(%arg0: i32) -> (i32, i32) {
    %c0_i32 = arith.constant 0 : i32
    %c0_i32_0 = arith.constant 0 : i32
    %c0_i32_1 = arith.constant 0 : i32
    return %c0_i32, %c0_i32_0 : i32, i32
  }
  func.func @transform_8(%arg0: i32) -> (i32, i32) {
    %c0_i32 = arith.constant 0 : i32
    %c0_i32_0 = arith.constant 0 : i32
    %c0_i32_1 = arith.constant 0 : i32
    return %c0_i32, %c0_i32_0 : i32, i32
  }
  func.func @transform_9(%arg0: i32) -> (i32, i32) {
    %c0_i32 = arith.constant 0 : i32
    %c0_i32_0 = arith.constant 0 : i32
    %c0_i32_1 = arith.constant 0 : i32
    return %c0_i32, %c0_i32_0 : i32, i32
  }
  func.func @transform_10(%arg0: i32) -> (i32, i32) {
    %c0_i32 = arith.constant 0 : i32
    %c0_i32_0 = arith.constant 0 : i32
    %c0_i32_1 = arith.constant 0 : i32
    return %c0_i32, %c0_i32_0 : i32, i32
  }
  func.func @transform_11(%arg0: i32) -> (i32, i32) {
    %c0_i32 = arith.constant 0 : i32
    %c0_i32_0 = arith.constant 0 : i32
    return %arg0, %c0_i32 : i32, i32
  }
}

</mosaic_0001>

<bundles_post_ra>
// kernel: mcd_forward.1
= control target key start
LH: loop header
LB: loop body
LE: loop exit
PB: predicated region body
PF: predicated region fallthrough
CT: control target
= control target key end

     0   :  { %vm52_vm0 = vcmask 1041408   ;;  %vm48_vm1 = vcmask 31744   ;;  %vm81_vm2 = vcmask 261120   ;;  %s685_s3 = inlined_call_operand.vmem [shape: bf16[4,128], index: 3, kind: input, shape index: {}]   ;;  %s686_s1 = inlined_call_operand.vmem [shape: f32[8,4], index: 1, kind: input, shape index: {}]   ;;  %s687_s2 = inlined_call_operand.vmem [shape: bf16[32,128], index: 2, kind: input, shape index: {}]   ;;  %s688_s5 = inlined_call_operand.vmem [shape: bf16[128,128], index: 5, kind: input, shape index: {}]   ;;  %s689_s0 = inlined_call_operand.vmem [shape: f32[8,32], index: 0, kind: input, shape index: {}]   ;;  %s690_s4 = inlined_call_operand.vmem [shape: f32[1,128], index: 4, kind: input, shape index: {}]   ;;  %s691_s6 = inlined_call_operand.vmem [shape: f32[1,128], index: 6, kind: input, shape index: {}]   ;;  %s692_s7 = inlined_call_operand.vmem [shape: bf16[128,128], index: 7, kind: input, shape index: {}]   ;;  %s693_s8 = inlined_call_operand.vmem [shape: f32[1,128], index: 8, kind: input, shape index: {}]   ;;  %s694_s9 = inlined_call_operand.vmem [shape: bf16[128,128], index: 9, kind: input, shape index: {}]   ;;  %s695_s10 = inlined_call_operand.vmem [shape: f32[1,128], index: 10, kind: input, shape index: {}]   ;;  %s696_s11 = inlined_call_operand.vmem [shape: f32[8,128], index: 11, kind: output, shape index: {}]  }
   0x1   :  { %v45_v0 = vld [vmem:[%s685_s3] sm:$0x3]  ;;  %v488_v2 = vld [vmem:[%s687_s2 + $0x8] sm:$0xff]  ;;  %v496_v5 = vld [vmem:[%s688_s5 + $0x38] sm:$0xff] }
   0x2   :  { %v46_v1 = vld [vmem:[%s686_s1] sm:$0xff]  ;;  %v54_v3 = vsel %vm52_vm0, %v45_v0, 0  ;;  %173 = vmatpush.bf16.msra.mxu2 %v496_v5  ;;  %v495_v7 = vld [vmem:[%s688_s5 + $0x30] sm:$0xff]  ;;  %v494_v10 = vld [vmem:[%s688_s5 + $0x28] sm:$0xff] }
   0x3   :  { %v47_v4 = vpack.c.bf16 %v46_v1, %v46_v1  ;;  %63 = vmatpush.bf16.msra.mxu1 %v54_v3  ;;  %v487_v6 = vld [vmem:[%s687_s2] sm:$0xff]  ;;  %v492_v12 = vld [vmem:[%s688_s5 + $0x18] sm:$0xff]  ;;  %v491_v13 = vld [vmem:[%s688_s5 + $0x10] sm:$0xff] }
   0x4   :  { %v43_v8 = vld [vmem:[%s689_s0] sm:$0xff]  ;;  %v490_v14 = vld [vmem:[%s688_s5 + $0x8] sm:$0xff]  ;;  %v504_v16 = vld [vmem:[%s692_s7 + $0x38] sm:$0xff] }
   0x5   :  { %v44_v9 = vpack.c.bf16 %v43_v8, %v43_v8  ;;  %v493_v11 = vld [vmem:[%s688_s5 + $0x20] sm:$0xff]  ;;  %256 = vmatpush.bf16.msra.mxu3 %v504_v16  ;;  %v503_v17 = vld [vmem:[%s692_s7 + $0x30] sm:$0xff]  ;;  %v502_v18 = vld [vmem:[%s692_s7 + $0x28] sm:$0xff] }
   0x6   :  { %380 = vmatmul.msk.bf16.vlgmr.msra.gmra.mxu1 %vm48_vm1, %v47_v4  ;;  %174 = vmatpush.bf16.msra.mxu2 %v495_v7  ;;  %v489_v15 = vld [vmem:[%s688_s5] sm:$0xff]  ;;  %v500_v21 = vld [vmem:[%s692_s7 + $0x18] sm:$0xff]  ;;  %v499_v23 = vld [vmem:[%s692_s7 + $0x10] sm:$0xff] }
   0x7   :  { %91 = vmatpush.bf16.msrb.mxu1 %v488_v2  ;;  %v501_v20 = vld [vmem:[%s692_s7 + $0x20] sm:$0xff]  ;;  %v498_v31 = vld [vmem:[%s692_s7 + $0x8] sm:$0xff]  ;;  %v512_v33 = vld [vmem:[%s694_s9 + $0x38] sm:$0xff] }
   0x8   :  { %v514_v24 = vld [vmem:[%s690_s4] ss:$0 sm:$0xff]  ;;  %339 = vmatpush.bf16.msra.mxu0 %v512_v33  ;;  %v511_v34 = vld [vmem:[%s694_s9 + $0x30] sm:$0xff]  ;;  %v510_v35 = vld [vmem:[%s694_s9 + $0x28] sm:$0xff] }
   0x9   :  { %257 = vmatpush.bf16.msra.mxu3 %v503_v17  ;;  %v497_v32 = vld [vmem:[%s692_s7] sm:$0xff]  ;;  %v508_v37 = vld [vmem:[%s694_s9 + $0x18] sm:$0xff]  ;;  %v507_v38 = vld [vmem:[%s694_s9 + $0x10] sm:$0xff] }
   0xa   :  { %175 = vmatpush.bf16.msra.mxu2 %v494_v10  ;;  %v509_v36 = vld [vmem:[%s694_s9 + $0x20] sm:$0xff]  ;;  %v506_v45 = vld [vmem:[%s694_s9 + $0x8] sm:$0xff] }
   0xb   :  { %92 = vmatpush.bf16.msrb.mxu1 %v487_v6  ;;  %v515_v39 = vld [vmem:[%s691_s6] ss:$0 sm:$0xff] }
   0xc   :  { %340 = vmatpush.bf16.msra.mxu0 %v511_v34  ;;  %v505_v46 = vld [vmem:[%s694_s9] sm:$0xff] }
   0xd   :  { %258 = vmatpush.bf16.msra.mxu3 %v502_v18  ;;  %v516_v47 = vld [vmem:[%s693_s8] ss:$0 sm:$0xff]  ;;  %s522_s8 = smov 64  }
   0xe   :  { %176 = vmatpush.bf16.msra.mxu2 %v493_v11  ;;  %v517_v53 = vld [vmem:[%s695_s10] ss:$0 sm:$0xff] }
  0x10   :  { %341 = vmatpush.bf16.msra.mxu0 %v510_v35 }
  0x11   :  { %259 = vmatpush.bf16.msra.mxu3 %v501_v20 }
  0x12   :  { %177 = vmatpush.bf16.msra.mxu2 %v492_v12 }
  0x14   :  { %342 = vmatpush.bf16.msra.mxu0 %v509_v36 }
  0x15   :  { %260 = vmatpush.bf16.msra.mxu3 %v500_v21 }
  0x16   :  { %389 = vmatmul.msk.bf16.vlgmr.msrb.gmra.mxu1 %vm81_vm2, %v44_v9  ;;  %178 = vmatpush.bf16.msra.mxu2 %v491_v13 }
  0x18   :  { %343 = vmatpush.bf16.msra.mxu0 %v508_v37 }
  0x19   :  { %261 = vmatpush.bf16.msra.mxu3 %v499_v23 }
  0x1a   :  { %179 = vmatpush.bf16.msra.mxu2 %v490_v14 }
  0x1c   :  { %344 = vmatpush.bf16.msra.mxu0 %v507_v38 }
  0x1d   :  { %262 = vmatpush.bf16.msra.mxu3 %v498_v31 }
  0x1e   :  { %180 = vmatpush.bf16.msra.mxu2 %v489_v15 }
  0x20   :  { %345 = vmatpush.bf16.msra.mxu0 %v506_v45 }
  0x21   :  { %263 = vmatpush.bf16.msra.mxu3 %v497_v32 }
  0x24   :  { %346 = vmatpush.bf16.msra.mxu0 %v505_v46 }
  0x83   :  { %v65_v19 = vpop.f32.mrf.mxu1 }
  0x8b   :  { %v67_v22 = vpop.f32.mrf.mxu1 }
  0x93   :  { %v94_v25 = vpop.f32.mrf.mxu1 }
  0x94   :  { %v95_v26 = vadd.f32 %v94_v25, %v65_v19 }
  0x96   :  { %v102_v27 = vadd.f32 %v514_v24, %v95_v26 }
  0x98   :  { %v103_v28 = vmax.f32 %v102_v27, 0.0 }
  0x9a   :  { %v121_v29 = vpack.c.bf16 %v103_v28, %v103_v28 }
  0x9b   :  { %v96_v30 = vpop.f32.mrf.mxu1 }
  0x9c   :  { %181 = vmatmul.bf16.vlgmr.msra.gmra.mxu2 %v121_v29 }
 0x11f   :  { %v182_v40 = vpop.f32.mrf.mxu2 }
 0x120   :  { %v183_v41 = vadd.f32 %v515_v39, %v182_v40 }
 0x122   :  { %v186_v42 = vmax.f32 %v183_v41, 0.0 }
 0x124   :  { %v204_v43 = vpack.c.bf16 %v186_v42, %v186_v42 }
 0x126   :  { %264 = vmatmul.bf16.vlgmr.msra.gmra.mxu3 %v204_v43 }
 0x127   :  { %v184_v44 = vpop.f32.mrf.mxu2 }
 0x1a9   :  { %v265_v48 = vpop.f32.mrf.mxu3 }
 0x1aa   :  { %v266_v49 = vadd.f32 %v516_v47, %v265_v48 }
 0x1ac   :  { %v269_v50 = vmax.f32 %v266_v49, 0.0 }
 0x1ae   :  { %v287_v51 = vpack.c.bf16 %v269_v50, %v269_v50 }
 0x1b0   :  { %347 = vmatmul.bf16.vlgmr.msra.gmra.mxu0 %v287_v51 }
 0x1b1   :  { %v267_v52 = vpop.f32.mrf.mxu3 }
 0x22d   :  { %v348_v54 = vpop.f32.mrf.mxu0 }
 0x22e   :  { %v349_v55 = vadd.f32 %v517_v53, %v348_v54 }
 0x230   :  { %v486_v56 = vmul.f32 -1.442695, %v349_v55 }
 0x232   :  { %518 = vpow2.f32 %v486_v56 }
 0x235   :  { %v350_v57 = vpop.f32.mrf.mxu0 }
 0x238   :  { %v519_v58 = vpop.eup %518 }
 0x239   :  { %v355_v59 = vadd.f32 1.0, %v519_v58 }
 0x23b   :  { %520 = vrcp.f32 %v355_v59  ;;  %v367_v63 = vand.u32 2147483648, %v355_v59  ;;  %v365_v1 = vand.u32 2147483647, %v355_v59  ;;  %vm361_vm4 = vweird.f32 %v355_v59 }
 0x23d   :  { %v368_v3 = vor.u32 1.1754944e-38, %v367_v63  ;;  %vm366_vm6 = vcmp.eq.f32.partialorder %v365_v1, 8.507059e+37 }
 0x241   :  { %v521_v60 = vpop.eup %520 }
 0x242   :  { %v357_v61 = vmul.f32 %v521_v60, %v355_v59  ;;  %vm362_vm3 = vweird.f32 %v521_v60 }
 0x243   :  { %vm363_vm5 = vmor %vm361_vm4, %vm362_vm3 }
 0x244   :  { %v358_v62 = vsub.f32 1.0, %v357_v61 }
 0x246   :  { %v359_v0 = vmul.f32 %v521_v60, %v358_v62 }
 0x248   :  { %v360_v2 = vadd.f32 %v521_v60, %v359_v0 }
 0x24a   :  { %v364_v4 = vsel %vm363_vm5, %v521_v60, %v360_v2 }
 0x24b   :  { %v369_v5 = vsel %vm366_vm6, %v368_v3, %v364_v4 }
 0x24c   :  { %371 = vrot.lane.b32.xlu0 %v369_v5, %s522_s8 }
 0x2be   :  { %v372_v6 = vpop.permute.xlu0 %371 }
 0x2bf   :  { %v373_v7 = vadd.f32 %v372_v6, %v369_v5 }
 0x2c1   :  { %v374_v8 = vmul.f32 0.5, %v373_v7 }
 0x2c3   :  { %375 = vst [vmem:[%s696_s11] sm:$0xff] %v374_v8 }

// kernel: mcd_forward.1
= control target key start
LH: loop header
LB: loop body
LE: loop exit
PB: predicated region body
PF: predicated region fallthrough
CT: control target
= control target key end

     0   :  { %vm52_vm0 = vcmask 1041408   ;;  %vm48_vm1 = vcmask 31744   ;;  %vm81_vm2 = vcmask 261120   ;;  %s685_s3 = inlined_call_operand.vmem [shape: bf16[4,128], index: 3, kind: input, shape index: {}]   ;;  %s686_s1 = inlined_call_operand.vmem [shape: f32[8,4], index: 1, kind: input, shape index: {}]   ;;  %s687_s2 = inlined_call_operand.vmem [shape: bf16[32,128], index: 2, kind: input, shape index: {}]   ;;  %s688_s5 = inlined_call_operand.vmem [shape: bf16[128,128], index: 5, kind: input, shape index: {}]   ;;  %s689_s0 = inlined_call_operand.vmem [shape: f32[8,32], index: 0, kind: input, shape index: {}]   ;;  %s690_s4 = inlined_call_operand.vmem [shape: f32[1,128], index: 4, kind: input, shape index: {}]   ;;  %s691_s6 = inlined_call_operand.vmem [shape: f32[1,128], index: 6, kind: input, shape index: {}]   ;;  %s692_s7 = inlined_call_operand.vmem [shape: bf16[128,128], index: 7, kind: input, shape index: {}]   ;;  %s693_s8 = inlined_call_operand.vmem [shape: f32[1,128], index: 8, kind: input, shape index: {}]   ;;  %s694_s9 = inlined_call_operand.vmem [shape: bf16[128,128], index: 9, kind: input, shape index: {}]   ;;  %s695_s10 = inlined_call_operand.vmem [shape: f32[1,128], index: 10, kind: input, shape index: {}]   ;;  %s696_s11 = inlined_call_operand.vmem [shape: f32[8,128], index: 11, kind: output, shape index: {}]  }
   0x1   :  { %v45_v0 = vld [vmem:[%s685_s3] sm:$0x3]  ;;  %v488_v2 = vld [vmem:[%s687_s2 + $0x8] sm:$0xff]  ;;  %v496_v5 = vld [vmem:[%s688_s5 + $0x38] sm:$0xff] }
   0x2   :  { %v46_v1 = vld [vmem:[%s686_s1] sm:$0xff]  ;;  %v54_v3 = vsel %vm52_vm0, %v45_v0, 0  ;;  %173 = vmatpush.bf16.msra.mxu2 %v496_v5  ;;  %v495_v7 = vld [vmem:[%s688_s5 + $0x30] sm:$0xff]  ;;  %v494_v10 = vld [vmem:[%s688_s5 + $0x28] sm:$0xff] }
   0x3   :  { %v47_v4 = vpack.c.bf16 %v46_v1, %v46_v1  ;;  %63 = vmatpush.bf16.msra.mxu1 %v54_v3  ;;  %v487_v6 = vld [vmem:[%s687_s2] sm:$0xff]  ;;  %v492_v12 = vld [vmem:[%s688_s5 + $0x18] sm:$0xff]  ;;  %v491_v13 = vld [vmem:[%s688_s5 + $0x10] sm:$0xff] }
   0x4   :  { %v43_v8 = vld [vmem:[%s689_s0] sm:$0xff]  ;;  %v490_v14 = vld [vmem:[%s688_s5 + $0x8] sm:$0xff]  ;;  %v504_v16 = vld [vmem:[%s692_s7 + $0x38] sm:$0xff] }
   0x5   :  { %v44_v9 = vpack.c.bf16 %v43_v8, %v43_v8  ;;  %v493_v11 = vld [vmem:[%s688_s5 + $0x20] sm:$0xff]  ;;  %256 = vmatpush.bf16.msra.mxu3 %v504_v16  ;;  %v503_v17 = vld [vmem:[%s692_s7 + $0x30] sm:$0xff]  ;;  %v502_v18 = vld [vmem:[%s692_s7 + $0x28] sm:$0xff] }
   0x6   :  { %380 = vmatmul.msk.bf16.vlgmr.msra.gmra.mxu1 %vm48_vm1, %v47_v4  ;;  %174 = vmatpush.bf16.msra.mxu2 %v495_v7  ;;  %v489_v15 = vld [vmem:[%s688_s5] sm:$0xff]  ;;  %v500_v21 = vld [vmem:[%s692_s7 + $0x18] sm:$0xff]  ;;  %v499_v23 = vld [vmem:[%s692_s7 + $0x10] sm:$0xff] }
   0x7   :  { %91 = vmatpush.bf16.msrb.mxu1 %v488_v2  ;;  %v501_v20 = vld [vmem:[%s692_s7 + $0x20] sm:$0xff]  ;;  %v498_v31 = vld [vmem:[%s692_s7 + $0x8] sm:$0xff]  ;;  %v512_v33 = vld [vmem:[%s694_s9 + $0x38] sm:$0xff] }
   0x8   :  { %v514_v24 = vld [vmem:[%s690_s4] ss:$0 sm:$0xff]  ;;  %339 = vmatpush.bf16.msra.mxu0 %v512_v33  ;;  %v511_v34 = vld [vmem:[%s694_s9 + $0x30] sm:$0xff]  ;;  %v510_v35 = vld [vmem:[%s694_s9 + $0x28] sm:$0xff] }
   0x9   :  { %257 = vmatpush.bf16.msra.mxu3 %v503_v17  ;;  %v497_v32 = vld [vmem:[%s692_s7] sm:$0xff]  ;;  %v508_v37 = vld [vmem:[%s694_s9 + $0x18] sm:$0xff]  ;;  %v507_v38 = vld [vmem:[%s694_s9 + $0x10] sm:$0xff] }
   0xa   :  { %175 = vmatpush.bf16.msra.mxu2 %v494_v10  ;;  %v509_v36 = vld [vmem:[%s694_s9 + $0x20] sm:$0xff]  ;;  %v506_v45 = vld [vmem:[%s694_s9 + $0x8] sm:$0xff] }
   0xb   :  { %92 = vmatpush.bf16.msrb.mxu1 %v487_v6  ;;  %v515_v39 = vld [vmem:[%s691_s6] ss:$0 sm:$0xff] }
   0xc   :  { %340 = vmatpush.bf16.msra.mxu0 %v511_v34  ;;  %v505_v46 = vld [vmem:[%s694_s9] sm:$0xff] }
   0xd   :  { %258 = vmatpush.bf16.msra.mxu3 %v502_v18  ;;  %v516_v47 = vld [vmem:[%s693_s8] ss:$0 sm:$0xff]  ;;  %s522_s8 = smov 64  }
   0xe   :  { %176 = vmatpush.bf16.msra.mxu2 %v493_v11  ;;  %v517_v53 = vld [vmem:[%s695_s10] ss:$0 sm:$0xff] }
  0x10   :  { %341 = vmatpush.bf16.msra.mxu0 %v510_v35 }
  0x11   :  { %259 = vmatpush.bf16.msra.mxu3 %v501_v20 }
  0x12   :  { %177 = vmatpush.bf16.msra.mxu2 %v492_v12 }
  0x14   :  { %342 = vmatpush.bf16.msra.mxu0 %v509_v36 }
  0x15   :  { %260 = vmatpush.bf16.msra.mxu3 %v500_v21 }
  0x16   :  { %389 = vmatmul.msk.bf16.vlgmr.msrb.gmra.mxu1 %vm81_vm2, %v44_v9  ;;  %178 = vmatpush.bf16.msra.mxu2 %v491_v13 }
  0x18   :  { %343 = vmatpush.bf16.msra.mxu0 %v508_v37 }
  0x19   :  { %261 = vmatpush.bf16.msra.mxu3 %v499_v23 }
  0x1a   :  { %179 = vmatpush.bf16.msra.mxu2 %v490_v14 }
  0x1c   :  { %344 = vmatpush.bf16.msra.mxu0 %v507_v38 }
  0x1d   :  { %262 = vmatpush.bf16.msra.mxu3 %v498_v31 }
  0x1e   :  { %180 = vmatpush.bf16.msra.mxu2 %v489_v15 }
  0x20   :  { %345 = vmatpush.bf16.msra.mxu0 %v506_v45 }
  0x21   :  { %263 = vmatpush.bf16.msra.mxu3 %v497_v32 }
  0x24   :  { %346 = vmatpush.bf16.msra.mxu0 %v505_v46 }
  0x83   :  { %v65_v19 = vpop.f32.mrf.mxu1 }
  0x8b   :  { %v67_v22 = vpop.f32.mrf.mxu1 }
  0x93   :  { %v94_v25 = vpop.f32.mrf.mxu1 }
  0x94   :  { %v95_v26 = vadd.f32 %v94_v25, %v65_v19 }
  0x96   :  { %v102_v27 = vadd.f32 %v514_v24, %v95_v26 }
  0x98   :  { %v103_v28 = vmax.f32 %v102_v27, 0.0 }
  0x9a   :  { %v121_v29 = vpack.c.bf16 %v103_v28, %v103_v28 }
  0x9b   :  { %v96_v30 = vpop.f32.mrf.mxu1 }
  0x9c   :  { %181 = vmatmul.bf16.vlgmr.msra.gmra.mxu2 %v121_v29 }
 0x11f   :  { %v182_v40 = vpop.f32.mrf.mxu2 }
 0x120   :  { %v183_v41 = vadd.f32 %v515_v39, %v182_v40 }
 0x122   :  { %v186_v42 = vmax.f32 %v183_v41, 0.0 }
 0x124   :  { %v204_v43 = vpack.c.bf16 %v186_v42, %v186_v42 }
 0x126   :  { %264 = vmatmul.bf16.vlgmr.msra.gmra.mxu3 %v204_v43 }
 0x127   :  { %v184_v44 = vpop.f32.mrf.mxu2 }
 0x1a9   :  { %v265_v48 = vpop.f32.mrf.mxu3 }
 0x1aa   :  { %v266_v49 = vadd.f32 %v516_v47, %v265_v48 }
 0x1ac   :  { %v269_v50 = vmax.f32 %v266_v49, 0.0 }
 0x1ae   :  { %v287_v51 = vpack.c.bf16 %v269_v50, %v269_v50 }
 0x1b0   :  { %347 = vmatmul.bf16.vlgmr.msra.gmra.mxu0 %v287_v51 }
 0x1b1   :  { %v267_v52 = vpop.f32.mrf.mxu3 }
 0x22d   :  { %v348_v54 = vpop.f32.mrf.mxu0 }
 0x22e   :  { %v349_v55 = vadd.f32 %v517_v53, %v348_v54 }
 0x230   :  { %v486_v56 = vmul.f32 -1.442695, %v349_v55 }
 0x232   :  { %518 = vpow2.f32 %v486_v56 }
 0x235   :  { %v350_v57 = vpop.f32.mrf.mxu0 }
 0x238   :  { %v519_v58 = vpop.eup %518 }
 0x239   :  { %v355_v59 = vadd.f32 1.0, %v519_v58 }
 0x23b   :  { %520 = vrcp.f32 %v355_v59  ;;  %v367_v63 = vand.u32 2147483648, %v355_v59  ;;  %v365_v1 = vand.u32 2147483647, %v355_v59  ;;  %vm361_vm4 = vweird.f32 %v355_v59 }
 0x23d   :  { %v368_v3 = vor.u32 1.1754944e-38, %v367_v63  ;;  %vm366_vm6 = vcmp.eq.f32.partialorder %v365_v1, 8.507059e+37 }
 0x241   :  { %v521_v60 = vpop.eup %520 }
 0x242   :  { %v357_v61 = vmul.f32 %v521_v60, %v355_v59  ;;  %vm362_vm3 = vweird.f32 %v521_v60 }
 0x243   :  { %vm363_vm5 = vmor %vm361_vm4, %vm362_vm3 }
 0x244   :  { %v358_v62 = vsub.f32 1.0, %v357_v61 }
 0x246   :  { %v359_v0 = vmul.f32 %v521_v60, %v358_v62 }
 0x248   :  { %v360_v2 = vadd.f32 %v521_v60, %v359_v0 }
 0x24a   :  { %v364_v4 = vsel %vm363_vm5, %v521_v60, %v360_v2 }
 0x24b   :  { %v369_v5 = vsel %vm366_vm6, %v368_v3, %v364_v4 }
 0x24c   :  { %371 = vrot.lane.b32.xlu0 %v369_v5, %s522_s8 }
 0x2be   :  { %v372_v6 = vpop.permute.xlu0 %371 }
 0x2bf   :  { %v373_v7 = vadd.f32 %v372_v6, %v369_v5 }
 0x2c1   :  { %v374_v8 = vmul.f32 0.5, %v373_v7 }
 0x2c3   :  { %375 = vst [vmem:[%s696_s11] sm:$0xff] %v374_v8 }

</bundles_post_ra>
